<compile_context>
chip_gen: v7x
topology: tpu7x:2x2x1
jax: 0.10.0
libtpu: 0.0.40
codegen_flags: <defaults>
</compile_context>

<pallas_src>
import jax
import jax.numpy as jnp
from jax.experimental import pallas as pl
from jax.experimental.pallas import tpu as pltpu


def rnn_kernel(x_ref, wih_ref, whh_ref, b_ref, wfc_ref, bfc_ref, out_ref, hid_ref):
    # x_ref:   (T*B, D)  time-major flattened input (row t*B + b  ==  x[b, t, :])
    # wih_ref: (D, H)    input->hidden weight (pre-transposed)
    # whh_ref: (H, H)    hidden->hidden weight (pre-transposed)
    # b_ref:   (1, H)    fused bias (b_ih + b_hh)
    # wfc_ref: (H, A)    final linear weight (pre-transposed)
    # bfc_ref: (1, A)
    # out_ref: (B, A)    clamped action values
    # hid_ref: (B, H)    final hidden state (wrapper adds the leading num_layers=1 dim)
    B, H = hid_ref.shape
    T = x_ref.shape[0] // B

    # Hoisted input projection: single batched MXU matmul + one fused-bias add,
    # done once, off the serial per-step critical path.
    xw = (jnp.dot(x_ref[...], wih_ref[...], preferred_element_type=jnp.float32)
          + b_ref[...])                                            # (T*B, H)

    whh = whh_ref[...]                                             # load once

    # Serial recurrence. T is a static Python int, so this loop is a full unroll:
    # every slice below is static and h stays vreg-resident across steps.
    h = jnp.zeros((B, H), jnp.float32)
    for t in range(T):
        pre = xw[t * B:(t + 1) * B, :] + jnp.dot(
            h, whh, preferred_element_type=jnp.float32)
        h = jnp.tanh(pre)                                          # EUP transcendental

    # Epilogue: final linear + clamp, written straight to the output refs.
    logits = jnp.dot(h, wfc_ref[...], preferred_element_type=jnp.float32) + bfc_ref[...]
    out_ref[...] = jnp.clip(logits, -1.0, 1.0)   # lane dim A=2 -> masked store, accepted
    hid_ref[...] = h


@jax.jit
def rnn_approximator_forward(x, params):
    """x: (B, T, input_dim) float32 (batch_first, like the PyTorch module).
    Returns (out, hidden): out (B, action_dim), hidden (1, B, hidden_dim)."""
    w_ih, w_hh, b_ih, b_hh, w_fc, b_fc = params
    B, T, D = x.shape
    H = w_hh.shape[0]
    A = w_fc.shape[0]

    # Glue: time-major flatten + pre-transposed weights + fused biases.
    x_flat = jnp.transpose(x, (1, 0, 2)).reshape(T * B, D).astype(jnp.float32)
    wih_t = jnp.transpose(w_ih).astype(jnp.float32)                # (D, H)
    whh_t = jnp.transpose(w_hh).astype(jnp.float32)                # (H, H)
    wfc_t = jnp.transpose(w_fc).astype(jnp.float32)                # (H, A)
    b_fused = (b_ih + b_hh).reshape(1, H).astype(jnp.float32)      # (1, H)
    bfc2 = b_fc.reshape(1, A).astype(jnp.float32)                  # (1, A)

    out, h_last = pl.pallas_call(
        rnn_kernel,
        out_shape=(
            jax.ShapeDtypeStruct((B, A), jnp.float32),
            jax.ShapeDtypeStruct((B, H), jnp.float32),
        ),
        in_specs=[pl.BlockSpec(memory_space=pltpu.MemorySpace.VMEM)] * 6,
        out_specs=(
            pl.BlockSpec(memory_space=pltpu.MemorySpace.VMEM),
            pl.BlockSpec(memory_space=pltpu.MemorySpace.VMEM),
        ),
    )(x_flat, wih_t, whh_t, b_fused, wfc_t, bfc2)
    # TODO(synk): if T/B/D grow large, stream the time axis with a grid ("arbitrary")
    # and shard batch across TensorCores ("parallel") instead of whole-array VMEM.
    return out, h_last[None]                                       # hidden: (1, B, H)


def init_params(key, input_dim=8, hidden_dim=64, action_dim=2):
    """Synthetic init matching nn.RNN / nn.Linear parameter shapes
    (uniform in +-1/sqrt(hidden_dim), like PyTorch's default)."""
    ks = jax.random.split(key, 6)
    bound = 1.0 / jnp.sqrt(jnp.float32(hidden_dim))
    w_ih = jax.random.uniform(ks[0], (hidden_dim, input_dim), jnp.float32, -bound, bound)
    w_hh = jax.random.uniform(ks[1], (hidden_dim, hidden_dim), jnp.float32, -bound, bound)
    b_ih = jax.random.uniform(ks[2], (hidden_dim,), jnp.float32, -bound, bound)
    b_hh = jax.random.uniform(ks[3], (hidden_dim,), jnp.float32, -bound, bound)
    w_fc = jax.random.uniform(ks[4], (action_dim, hidden_dim), jnp.float32, -bound, bound)
    b_fc = jax.random.uniform(ks[5], (action_dim,), jnp.float32, -bound, bound)
    return (w_ih, w_hh, b_ih, b_hh, w_fc, b_fc)


def reference_forward(x, params):
    """Pure-JAX reference (mirrors torch.nn.RNN + Linear + clamp)."""
    w_ih, w_hh, b_ih, b_hh, w_fc, b_fc = params
    B, T, _ = x.shape
    H = w_hh.shape[0]
    h = jnp.zeros((B, H), jnp.float32)
    for t in range(T):
        h = jnp.tanh(x[:, t, :] @ w_ih.T + b_ih + h @ w_hh.T + b_hh)
    out = jnp.clip(h @ w_fc.T + b_fc, -1.0, 1.0)
    return out, h[None]


if __name__ == "__main__":
    B, T, INPUT_DIM, HIDDEN_DIM, ACTION_DIM = 2, 8, 8, 64, 2

    key = jax.random.PRNGKey(0)
    k_x, k_p = jax.random.split(key)
    x = jax.random.normal(k_x, (B, T, INPUT_DIM), jnp.float32)
    params = init_params(k_p, INPUT_DIM, HIDDEN_DIM, ACTION_DIM)

    out, hidden = rnn_approximator_forward(x, params)
    out = jax.block_until_ready(out)
    hidden = jax.block_until_ready(hidden)

    ref_out, ref_hidden = reference_forward(x, params)
    assert out.shape == (B, ACTION_DIM)
    assert hidden.shape == (1, B, HIDDEN_DIM)
    assert jnp.allclose(out, ref_out, atol=1e-5, rtol=1e-5)
    assert jnp.allclose(hidden, ref_hidden, atol=1e-5, rtol=1e-5)

    print("KERNEL_OK")
</pallas_src>

<mosaic_0001>
module attributes {stable_mosaic.version = 11 : i64} {
  func.func @rnn_kernel(%arg0: memref<16x8xf32, #tpu.memory_space<vmem>>, %arg1: memref<8x64xf32, #tpu.memory_space<vmem>>, %arg2: memref<64x64xf32, #tpu.memory_space<vmem>>, %arg3: memref<1x64xf32, #tpu.memory_space<vmem>>, %arg4: memref<64x2xf32, #tpu.memory_space<vmem>>, %arg5: memref<1x2xf32, #tpu.memory_space<vmem>>, %arg6: memref<2x2xf32, #tpu.memory_space<vmem>>, %arg7: memref<2x64xf32, #tpu.memory_space<vmem>>) attributes {dimension_semantics = [], scalar_prefetch = 0 : i64, scratch_operands = 0 : i64, tpu.core_type = #tpu.core_type<tc>} {
    %c0 = arith.constant 0 : index
    %c0_0 = arith.constant 0 : index
    %0 = vector.load %arg0[%c0, %c0_0] : memref<16x8xf32, #tpu.memory_space<vmem>>, vector<16x8xf32>
    %c0_1 = arith.constant 0 : index
    %c0_2 = arith.constant 0 : index
    %1 = vector.load %arg1[%c0_1, %c0_2] : memref<8x64xf32, #tpu.memory_space<vmem>>, vector<8x64xf32>
    %cst = arith.constant dense<0.000000e+00> : vector<16x64xf32>
    %2 = tpu.matmul %0, %1, %cst {dimension_numbers = #tpu.dot_dimension_numbers<[1], [0], [0], [1], [0, 0, 1, 1], [], []>} : vector<16x8xf32>, vector<8x64xf32>, vector<16x64xf32> -> vector<16x64xf32>
    %c0_3 = arith.constant 0 : index
    %c0_4 = arith.constant 0 : index
    %3 = vector.load %arg3[%c0_3, %c0_4] : memref<1x64xf32, #tpu.memory_space<vmem>>, vector<1x64xf32>
    %4 = vector.broadcast %3 : vector<1x64xf32> to vector<16x64xf32>
    %5 = arith.addf %2, %4 : vector<16x64xf32>
    %c0_5 = arith.constant 0 : index
    %c0_6 = arith.constant 0 : index
    %6 = vector.load %arg2[%c0_5, %c0_6] : memref<64x64xf32, #tpu.memory_space<vmem>>, vector<64x64xf32>
    %cst_7 = arith.constant 0.000000e+00 : f32
    %7 = vector.broadcast %cst_7 : f32 to vector<2x64xf32>
    %8 = vector.extract_strided_slice %5 {offsets = [0, 0], sizes = [2, 64], strides = [1, 1]} : vector<16x64xf32> to vector<2x64xf32>
    %cst_8 = arith.constant dense<0.000000e+00> : vector<2x64xf32>
    %9 = tpu.matmul %7, %6, %cst_8 {dimension_numbers = #tpu.dot_dimension_numbers<[1], [0], [0], [1], [0, 0, 1, 1], [], []>} : vector<2x64xf32>, vector<64x64xf32>, vector<2x64xf32> -> vector<2x64xf32>
    %10 = arith.addf %8, %9 : vector<2x64xf32>
    %11 = math.tanh %10 : vector<2x64xf32>
    %12 = vector.extract_strided_slice %5 {offsets = [2, 0], sizes = [2, 64], strides = [1, 1]} : vector<16x64xf32> to vector<2x64xf32>
    %cst_9 = arith.constant dense<0.000000e+00> : vector<2x64xf32>
    %13 = tpu.matmul %11, %6, %cst_9 {dimension_numbers = #tpu.dot_dimension_numbers<[1], [0], [0], [1], [0, 0, 1, 1], [], []>} : vector<2x64xf32>, vector<64x64xf32>, vector<2x64xf32> -> vector<2x64xf32>
    %14 = arith.addf %12, %13 : vector<2x64xf32>
    %15 = math.tanh %14 : vector<2x64xf32>
    %16 = vector.extract_strided_slice %5 {offsets = [4, 0], sizes = [2, 64], strides = [1, 1]} : vector<16x64xf32> to vector<2x64xf32>
    %cst_10 = arith.constant dense<0.000000e+00> : vector<2x64xf32>
    %17 = tpu.matmul %15, %6, %cst_10 {dimension_numbers = #tpu.dot_dimension_numbers<[1], [0], [0], [1], [0, 0, 1, 1], [], []>} : vector<2x64xf32>, vector<64x64xf32>, vector<2x64xf32> -> vector<2x64xf32>
    %18 = arith.addf %16, %17 : vector<2x64xf32>
    %19 = math.tanh %18 : vector<2x64xf32>
    %20 = vector.extract_strided_slice %5 {offsets = [6, 0], sizes = [2, 64], strides = [1, 1]} : vector<16x64xf32> to vector<2x64xf32>
    %cst_11 = arith.constant dense<0.000000e+00> : vector<2x64xf32>
    %21 = tpu.matmul %19, %6, %cst_11 {dimension_numbers = #tpu.dot_dimension_numbers<[1], [0], [0], [1], [0, 0, 1, 1], [], []>} : vector<2x64xf32>, vector<64x64xf32>, vector<2x64xf32> -> vector<2x64xf32>
    %22 = arith.addf %20, %21 : vector<2x64xf32>
    %23 = math.tanh %22 : vector<2x64xf32>
    %24 = vector.extract_strided_slice %5 {offsets = [8, 0], sizes = [2, 64], strides = [1, 1]} : vector<16x64xf32> to vector<2x64xf32>
    %cst_12 = arith.constant dense<0.000000e+00> : vector<2x64xf32>
    %25 = tpu.matmul %23, %6, %cst_12 {dimension_numbers = #tpu.dot_dimension_numbers<[1], [0], [0], [1], [0, 0, 1, 1], [], []>} : vector<2x64xf32>, vector<64x64xf32>, vector<2x64xf32> -> vector<2x64xf32>
    %26 = arith.addf %24, %25 : vector<2x64xf32>
    %27 = math.tanh %26 : vector<2x64xf32>
    %28 = vector.extract_strided_slice %5 {offsets = [10, 0], sizes = [2, 64], strides = [1, 1]} : vector<16x64xf32> to vector<2x64xf32>
    %cst_13 = arith.constant dense<0.000000e+00> : vector<2x64xf32>
    %29 = tpu.matmul %27, %6, %cst_13 {dimension_numbers = #tpu.dot_dimension_numbers<[1], [0], [0], [1], [0, 0, 1, 1], [], []>} : vector<2x64xf32>, vector<64x64xf32>, vector<2x64xf32> -> vector<2x64xf32>
    %30 = arith.addf %28, %29 : vector<2x64xf32>
    %31 = math.tanh %30 : vector<2x64xf32>
    %32 = vector.extract_strided_slice %5 {offsets = [12, 0], sizes = [2, 64], strides = [1, 1]} : vector<16x64xf32> to vector<2x64xf32>
    %cst_14 = arith.constant dense<0.000000e+00> : vector<2x64xf32>
    %33 = tpu.matmul %31, %6, %cst_14 {dimension_numbers = #tpu.dot_dimension_numbers<[1], [0], [0], [1], [0, 0, 1, 1], [], []>} : vector<2x64xf32>, vector<64x64xf32>, vector<2x64xf32> -> vector<2x64xf32>
    %34 = arith.addf %32, %33 : vector<2x64xf32>
    %35 = math.tanh %34 : vector<2x64xf32>
    %36 = vector.extract_strided_slice %5 {offsets = [14, 0], sizes = [2, 64], strides = [1, 1]} : vector<16x64xf32> to vector<2x64xf32>
    %cst_15 = arith.constant dense<0.000000e+00> : vector<2x64xf32>
    %37 = tpu.matmul %35, %6, %cst_15 {dimension_numbers = #tpu.dot_dimension_numbers<[1], [0], [0], [1], [0, 0, 1, 1], [], []>} : vector<2x64xf32>, vector<64x64xf32>, vector<2x64xf32> -> vector<2x64xf32>
    %38 = arith.addf %36, %37 : vector<2x64xf32>
    %39 = math.tanh %38 : vector<2x64xf32>
    %c0_16 = arith.constant 0 : index
    %c0_17 = arith.constant 0 : index
    %40 = vector.load %arg4[%c0_16, %c0_17] : memref<64x2xf32, #tpu.memory_space<vmem>>, vector<64x2xf32>
    %cst_18 = arith.constant dense<0.000000e+00> : vector<2x2xf32>
    %41 = tpu.matmul %39, %40, %cst_18 {dimension_numbers = #tpu.dot_dimension_numbers<[1], [0], [0], [1], [0, 0, 1, 1], [], []>} : vector<2x64xf32>, vector<64x2xf32>, vector<2x2xf32> -> vector<2x2xf32>
    %c0_19 = arith.constant 0 : index
    %c0_20 = arith.constant 0 : index
    %42 = vector.load %arg5[%c0_19, %c0_20] : memref<1x2xf32, #tpu.memory_space<vmem>>, vector<1x2xf32>
    %43 = vector.broadcast %42 : vector<1x2xf32> to vector<2x2xf32>
    %44 = arith.addf %41, %43 : vector<2x2xf32>
    %cst_21 = arith.constant -1.000000e+00 : f32
    %cst_22 = arith.constant 1.000000e+00 : f32
    %45 = vector.broadcast %cst_21 : f32 to vector<2x2xf32>
    %46 = arith.maximumf %45, %44 : vector<2x2xf32>
    %47 = vector.broadcast %cst_22 : f32 to vector<2x2xf32>
    %48 = arith.minimumf %47, %46 : vector<2x2xf32>
    %c0_23 = arith.constant 0 : index
    %c0_24 = arith.constant 0 : index
    %49 = vector.load %arg6[%c0_23, %c0_24] : memref<2x2xf32, #tpu.memory_space<vmem>>, vector<2x2xf32>
    tpu.vector_store %arg6[%c0_23, %c0_24], %48 {strides = array<i32>} : memref<2x2xf32, #tpu.memory_space<vmem>>, vector<2x2xf32>,
    %c0_25 = arith.constant 0 : index
    %c0_26 = arith.constant 0 : index
    %50 = vector.load %arg7[%c0_25, %c0_26] : memref<2x64xf32, #tpu.memory_space<vmem>>, vector<2x64xf32>
    tpu.vector_store %arg7[%c0_25, %c0_26], %39 {strides = array<i32>} : memref<2x64xf32, #tpu.memory_space<vmem>>, vector<2x64xf32>,
    return
  }
}

</mosaic_0001>

<bundles_post_ra>
// kernel: rnn_approximator_forward.1
= control target key start
LH: loop header
LB: loop body
LE: loop exit
PB: predicated region body
PF: predicated region fallthrough
CT: control target
= control target key end

     0   :  { %13 = vsyncpa [#allocation3], 0  ;;  %v1324_v3 = vmov 0.0|0.0   ;;  %vm37_vm0 = vcmask 64512   ;;  %vm1325_vm1 = vmmov 0   ;;  %v1326_v8 = vmov 0.0   ;;  %s1565_s0 = inlined_call_operand.vmem [shape: f32[16,8], index: 0, kind: input, shape index: {}]   ;;  %s1566_s1 = inlined_call_operand.vmem [shape: f32[8,64], index: 1, kind: input, shape index: {}]   ;;  %s1567_s2 = inlined_call_operand.vmem [shape: f32[64,64], index: 2, kind: input, shape index: {}]   ;;  %s1568_s3 = inlined_call_operand.vmem [shape: f32[1,64], index: 3, kind: input, shape index: {}]   ;;  %s1569_s4 = inlined_call_operand.vmem [shape: f32[64,2], index: 4, kind: input, shape index: {}]   ;;  %s1570_s5 = inlined_call_operand.vmem [shape: f32[1,2], index: 5, kind: input, shape index: {}]   ;;  %s1571_s6 = inlined_call_operand.hbm [shape: f32[2,2], index: 6, kind: output, shape index: {0}]   ;;  %s1572_s7 = inlined_call_operand.hbm [shape: f32[2,64], index: 7, kind: output, shape index: {1}]  }
   0x1   :  { %v119_v0 = vld [vmem:[%s1567_s2] sm:$0xff]  ;;  %v120_v1 = vld [vmem:[%s1567_s2 + $0x8] sm:$0xff]  ;;  %v121_v2 = vld [vmem:[%s1567_s2 + $0x10] sm:$0xff]  ;;  %1147 = vmatprep.subr.bf16.mxu1 %v1324_v3  ;;  %992 = vmatprep.mubr.msk.f32.mxu1 %vm1325_vm1, %v1326_v8 }
   0x2   :  { %v1379_v4 = vpack.c.bf16 %v120_v1, %v119_v0  ;;  %v122_v5 = vld [vmem:[%s1567_s2 + $0x18] sm:$0xff]  ;;  %v29_v6 = vld [vmem:[%s1566_s1] sm:$0xff]  ;;  %v28_v10 = vld [vmem:[%s1565_s0 + $0x8] sm:$0xff] }
   0x3   :  { %v27_v7 = vld [vmem:[%s1565_s0] sm:$0xff]  ;;  %v1393_v9 = vpack.c.bf16 %v122_v5, %v121_v2  ;;  %971 = vmatprep.subr.mxu0 %v29_v6 }
   0x4   :  { %1149 = vmatpush3.bf16.msra.mxu1 %v1379_v4 }
   0x5   :  { %14 = vsyncpa [#allocation5], 0  ;;  %1150 = vmatprep.subr.bf16.mxu1 %v1324_v3  ;;  %v123_v11 = vld [vmem:[%s1567_s2 + $0x20] sm:$0xff]  ;;  %v124_v12 = vld [vmem:[%s1567_s2 + $0x28] sm:$0xff]  ;;  %972 = vmatpush3.msra.mxu0 %v29_v6  ;;  %vm127_vm2 = vcmask 523264   ;;  %vm844_vm3 = vcmask 523270  }
   0x6   :  { %973 = vmatprep.mubr.msk.f32.mxu0 %vm37_vm0, %v27_v7  ;;  %1159 = vmatprep.subr.bf16.mxu0 %v1324_v3  ;;  %v1407_v13 = vpack.c.bf16 %v124_v12, %v123_v11  ;;  %v125_v14 = vld [vmem:[%s1567_s2 + $0x30] sm:$0xff]  ;;  %v126_v15 = vld [vmem:[%s1567_s2 + $0x38] sm:$0xff]  ;;  %v874_v17 = vld [vmem:[%s1568_s3] ss:$0 sm:$0xff]  ;;  %s1327_s14 = smov [#allocation4]  }
   0x7   :  { %974 = vmatmul.mubr.msk.f32.vlgmr.msra.gmra.mrb[0].mxu0 %vm37_vm0, %v28_v10  ;;  %v1421_v16 = vpack.c.bf16 %v126_v15, %v125_v14  ;;  %v751_v60 = vld [vmem:[%s1569_s4] sm:$0xff]  ;;  %v752_v61 = vld [vmem:[%s1569_s4 + $0x8] sm:$0xff]  ;;  %v753_v63 = vld [vmem:[%s1569_s4 + $0x10] sm:$0xff]  ;;  %s862_s1 = sshll.u32 %s1327_s14, 4  ;;  %s863_s1 = int_to_ptr.vmem [resolvable:$true] %s862_s1 }
   0x8   :  { %1152 = vmatpush3.bf16.msra.mxu1 %v1393_v9  ;;  %1161 = vmatpush3.bf16.msra.mxu0 %v1379_v4  ;;  %v1244_v62 = vpack.c.bf16 %v752_v61, %v751_v60  ;;  %v754_v0 = vld [vmem:[%s1569_s4 + $0x18] sm:$0xff]  ;;  %v755_v2 = vld [vmem:[%s1569_s4 + $0x20] sm:$0xff]  ;;  %v757_v6 = vld [vmem:[%s1569_s4 + $0x30] sm:$0xff]  ;;  %p1281_p1 = scmp.lt.s32.totalorder %s863_s1, %s863_s1 }
   0x9   :  { %1153 = vmatprep.subr.bf16.mxu1 %v1324_v3  ;;  %1162 = vmatprep.subr.bf16.mxu0 %v1324_v3  ;;  %v1247_v1 = vpack.c.bf16 %v754_v0, %v753_v63  ;;  %v758_v7 = vld [vmem:[%s1569_s4 + $0x38] sm:$0xff] }
   0xa   :  { %1011 = vmatprep.mubr.msk.f32.mxu0 %vm1325_vm1, %v1326_v8 }
   0xc   :  { %1155 = vmatpush3.bf16.msra.mxu1 %v1407_v13  ;;  %1164 = vmatpush3.bf16.msra.mxu0 %v1393_v9 }
   0xd   :  { %1156 = vmatprep.subr.bf16.mxu1 %v1324_v3  ;;  %1165 = vmatprep.subr.bf16.mxu0 %v1324_v3 }
  0x10   :  { %1158 = vmatpush3.bf16.msra.mxu1 %v1421_v16  ;;  %1167 = vmatpush3.bf16.msra.mxu0 %v1407_v13 }
  0x11   :  { %1168 = vmatprep.subr.bf16.mxu0 %v1324_v3  ;;  %1171 = vmatprep.subr.bf16.mxu1 %v1324_v3 }
  0x13   :  { %993 = vmatmul.mubr.f32.vlgmr.msra.gmra.mrb[0].mxu1 %v1326_v8 }
  0x14   :  { %1170 = vmatpush3.bf16.msra.mxu0 %v1421_v16  ;;  %1173 = vmatpush3.bf16.msra.mxu1 %v1379_v4 }
  0x15   :  { %1174 = vmatprep.subr.bf16.mxu1 %v1324_v3  ;;  %1030 = vmatprep.mubr.msk.f32.mxu1 %vm1325_vm1, %v1326_v8 }
  0x16   :  { %1183 = vmatprep.subr.bf16.mxu0 %v1324_v3 }
  0x18   :  { %1176 = vmatpush3.bf16.msra.mxu1 %v1393_v9 }
  0x19   :  { %1177 = vmatprep.subr.bf16.mxu1 %v1324_v3 }
  0x1c   :  { %1179 = vmatpush3.bf16.msra.mxu1 %v1407_v13 }
  0x1d   :  { %1180 = vmatprep.subr.bf16.mxu1 %v1324_v3 }
  0x20   :  { %1182 = vmatpush3.bf16.msra.mxu1 %v1421_v16 }
  0x21   :  { %1195 = vmatprep.subr.bf16.mxu1 %v1324_v3 }
  0xda   :  { %v975_v18 = vpop.f32.mrb[0].mxu0 }
  0xdb   :  { %v1446_v19 = vadd.f32 %v975_v18, %v874_v17  ;;  %v110_v20 = vpop.f32.mrb[1].mxu0 }
  0xdc   :  { %v111_v21 = vadd.f32 %v874_v17, %v110_v20 }
  0xe6   :  { %v197_v22 = vpop.f32.mrb[0].mxu1 }
  0xe7   :  { %v201_v23 = vadd.f32 %v197_v22, %v111_v21  ;;  %v994_v24 = vpop.f32.mrb[1].mxu1 }
  0xe9   :  { %1260 = vtanh.f32 %v201_v23 }
  0xf3   :  { %v1261_v25 = vpop.eup %1260 }
  0xf4   :  { %1012 = vmatmul.mubr.msk.f32.vlgmr.msra.gmra.mrb[2].mxu0 %vm127_vm2, %v1261_v25 }
  0xf5   :  { %1185 = vmatpush3.bf16.msra.mxu0 %v1379_v4  ;;  %1049 = vmatprep.mubr.msk.f32.mxu0 %vm1325_vm1, %v1326_v8 }
  0xf6   :  { %1186 = vmatprep.subr.bf16.mxu0 %v1324_v3 }
  0xf9   :  { %1188 = vmatpush3.bf16.msra.mxu0 %v1393_v9 }
  0xfa   :  { %1189 = vmatprep.subr.bf16.mxu0 %v1324_v3 }
  0xfd   :  { %1191 = vmatpush3.bf16.msra.mxu0 %v1407_v13 }
  0xfe   :  { %1192 = vmatprep.subr.bf16.mxu0 %v1324_v3 }
 0x101   :  { %1194 = vmatpush3.bf16.msra.mxu0 %v1421_v16 }
 0x102   :  { %1207 = vmatprep.subr.bf16.mxu0 %v1324_v3 }
 0x1c7   :  { %v272_v26 = vpop.f32.mrb[2].mxu0 }
 0x1c8   :  { %v277_v27 = vrot.slane %v272_v26, 6  ;;  %v1013_v28 = vpop.f32.mrb[3].mxu0 }
 0x1ca   :  { %v279_v29 = vadd.f32 %v277_v27, %v111_v21 }
 0x1cc   :  { %1262 = vtanh.f32 %v279_v29 }
 0x1d6   :  { %v1263_v30 = vpop.eup %1262 }
 0x1d7   :  { %v282_v31 = vrot.slane %v1263_v30, 2 }
 0x1d9   :  { %1031 = vmatmul.mubr.msk.f32.vlgmr.msra.gmra.mrb[2].mxu1 %vm127_vm2, %v282_v31 }
 0x1da   :  { %1197 = vmatpush3.bf16.msra.mxu1 %v1379_v4  ;;  %1068 = vmatprep.mubr.msk.f32.mxu1 %vm1325_vm1, %v1326_v8 }
 0x1db   :  { %1198 = vmatprep.subr.bf16.mxu1 %v1324_v3 }
 0x1de   :  { %1200 = vmatpush3.bf16.msra.mxu1 %v1393_v9 }
 0x1df   :  { %1201 = vmatprep.subr.bf16.mxu1 %v1324_v3 }
 0x1e2   :  { %1203 = vmatpush3.bf16.msra.mxu1 %v1407_v13 }
 0x1e3   :  { %1204 = vmatprep.subr.bf16.mxu1 %v1324_v3 }
 0x1e6   :  { %1206 = vmatpush3.bf16.msra.mxu1 %v1421_v16 }
 0x1e7   :  { %1219 = vmatprep.subr.bf16.mxu1 %v1324_v3 }
 0x2ac   :  { %v351_v32 = vpop.f32.mrb[2].mxu1 }
 0x2ad   :  { %v356_v33 = vrot.slane %v351_v32, 4  ;;  %v1032_v34 = vpop.f32.mrb[3].mxu1 }
 0x2af   :  { %v358_v35 = vadd.f32 %v356_v33, %v111_v21 }
 0x2b1   :  { %1264 = vtanh.f32 %v358_v35 }
 0x2bb   :  { %v1265_v36 = vpop.eup %1264 }
 0x2bc   :  { %v361_v37 = vrot.slane %v1265_v36, 4 }
 0x2be   :  { %1050 = vmatmul.mubr.msk.f32.vlgmr.msra.gmra.mrb[4].mxu0 %vm127_vm2, %v361_v37 }
 0x2bf   :  { %1209 = vmatpush3.bf16.msra.mxu0 %v1379_v4  ;;  %1087 = vmatprep.mubr.msk.f32.mxu0 %vm1325_vm1, %v1326_v8 }
 0x2c0   :  { %1210 = vmatprep.subr.bf16.mxu0 %v1324_v3 }
 0x2c3   :  { %1212 = vmatpush3.bf16.msra.mxu0 %v1393_v9 }
 0x2c4   :  { %1213 = vmatprep.subr.bf16.mxu0 %v1324_v3 }
 0x2c7   :  { %1215 = vmatpush3.bf16.msra.mxu0 %v1407_v13 }
 0x2c8   :  { %1216 = vmatprep.subr.bf16.mxu0 %v1324_v3 }
 0x2cb   :  { %1218 = vmatpush3.bf16.msra.mxu0 %v1421_v16 }
 0x2cc   :  { %1231 = vmatprep.subr.bf16.mxu0 %v1324_v3 }
 0x391   :  { %v430_v38 = vpop.f32.mrb[4].mxu0 }
 0x392   :  { %v435_v39 = vrot.slane %v430_v38, 2  ;;  %v1051_v40 = vpop.f32.mrb[5].mxu0 }
 0x394   :  { %v437_v41 = vadd.f32 %v435_v39, %v111_v21 }
 0x396   :  { %1266 = vtanh.f32 %v437_v41 }
 0x3a0   :  { %v1267_v42 = vpop.eup %1266 }
 0x3a1   :  { %v440_v43 = vrot.slane %v1267_v42, 6 }
 0x3a3   :  { %1069 = vmatmul.mubr.msk.f32.vlgmr.msra.gmra.mrb[4].mxu1 %vm127_vm2, %v440_v43 }
 0x3a4   :  { %1221 = vmatpush3.bf16.msra.mxu1 %v1379_v4  ;;  %1106 = vmatprep.mubr.msk.f32.mxu1 %vm1325_vm1, %v1326_v8 }
 0x3a5   :  { %1222 = vmatprep.subr.bf16.mxu1 %v1324_v3 }
 0x3a8   :  { %1224 = vmatpush3.bf16.msra.mxu1 %v1393_v9 }
 0x3a9   :  { %1225 = vmatprep.subr.bf16.mxu1 %v1324_v3 }
 0x3ac   :  { %1227 = vmatpush3.bf16.msra.mxu1 %v1407_v13 }
 0x3ad   :  { %1228 = vmatprep.subr.bf16.mxu1 %v1324_v3 }
 0x3b0   :  { %1230 = vmatpush3.bf16.msra.mxu1 %v1421_v16 }
 0x3b1   :  { %1243 = vmatprep.subr.bf16.mxu1 %v1324_v3 }
 0x476   :  { %v509_v44 = vpop.f32.mrb[4].mxu1 }
 0x477   :  { %v513_v45 = vadd.f32 %v509_v44, %v1446_v19  ;;  %v1070_v46 = vpop.f32.mrb[5].mxu1 }
 0x479   :  { %1268 = vtanh.f32 %v513_v45 }
 0x483   :  { %v1269_v47 = vpop.eup %1268 }
 0x484   :  { %1088 = vmatmul.mubr.msk.f32.vlgmr.msra.gmra.mrb[6].mxu0 %vm127_vm2, %v1269_v47 }
 0x485   :  { %1233 = vmatpush3.bf16.msra.mxu0 %v1379_v4  ;;  %1125 = vmatprep.mubr.msk.f32.mxu0 %vm1325_vm1, %v1326_v8  ;;  %v756_v4 = vld [vmem:[%s1569_s4 + $0x28] sm:$0xff]  ;;  %s1276_s4 = scalar_lea.vmem %s863_s1, 32 }
 0x486   :  { %1234 = vmatprep.subr.bf16.mxu0 %v1324_v3  ;;  %v1250_v5 = vpack.c.bf16 %v756_v4, %v755_v2  ;;  %p1277_p0 = scmp.ne.s32.totalorder %s863_s1, %s1276_s4  ;;  %p1282_p2 = scmp.lt.s32.totalorder %s1276_s4, %s1276_s4 }
 0x488   :  { %p1283_p3 = por %p1282_p2, %p1281_p1 }
 0x489   :  { %1236 = vmatpush3.bf16.msra.mxu0 %v1393_v9 }
 0x48a   :  { %1237 = vmatprep.subr.bf16.mxu0 %v1324_v3  ;;  %p1284_p4 = pnand %p1283_p3, %p1277_p0 }
 0x48d   :  { %1239 = vmatpush3.bf16.msra.mxu0 %v1407_v13 }
 0x48e   :  { %1240 = vmatprep.subr.bf16.mxu0 %v1324_v3 }
 0x491   :  { %1242 = vmatpush3.bf16.msra.mxu0 %v1421_v16 }
 0x557   :  { %v584_v48 = vpop.f32.mrb[6].mxu0 }
 0x558   :  { %v589_v49 = vrot.slane %v584_v48, 6  ;;  %v1089_v50 = vpop.f32.mrb[7].mxu0 }
 0x55a   :  { %v591_v51 = vadd.f32 %v589_v49, %v1446_v19 }
 0x55c   :  { %1270 = vtanh.f32 %v591_v51 }
 0x566   :  { %v1271_v52 = vpop.eup %1270 }
 0x567   :  { %v594_v53 = vrot.slane %v1271_v52, 2 }
 0x569   :  { %1107 = vmatmul.mubr.msk.f32.vlgmr.msra.gmra.mrb[6].mxu1 %vm127_vm2, %v594_v53 }
 0x56a   :  { %1144 = vmatprep.mubr.msk.f32.mxu1 %vm1325_vm1, %v1326_v8  ;;  %1245 = vmatpush3.bf16.msra.mxu1 %v1244_v62  ;;  %v1253_v8 = vpack.c.bf16 %v758_v7, %v757_v6 }
 0x56b   :  { %1246 = vmatprep.subr.bf16.mxu1 %v1324_v3 }
 0x56e   :  { %1248 = vmatpush3.bf16.msra.mxu1 %v1247_v1 }
 0x56f   :  { %1249 = vmatprep.subr.bf16.mxu1 %v1324_v3 }
 0x572   :  { %1251 = vmatpush3.bf16.msra.mxu1 %v1250_v5 }
 0x573   :  { %1252 = vmatprep.subr.bf16.mxu1 %v1324_v3 }
 0x576   :  { %1254 = vmatpush3.bf16.msra.mxu1 %v1253_v8 }
 0x63c   :  { %v663_v54 = vpop.f32.mrb[6].mxu1 }
 0x63d   :  { %v668_v55 = vrot.slane %v663_v54, 4  ;;  %v1108_v56 = vpop.f32.mrb[7].mxu1 }
 0x63f   :  { %v670_v57 = vadd.f32 %v668_v55, %v1446_v19 }
 0x641   :  { %1272 = vtanh.f32 %v670_v57 }
 0x64b   :  { %v1273_v58 = vpop.eup %1272 }
 0x64c   :  { %v673_v59 = vrot.slane %v1273_v58, 4 }
 0x64e   :  { %1126 = vmatmul.mubr.msk.f32.vlgmr.msra.gmra.mrb[8].mxu0 %vm127_vm2, %v673_v59 }
 0x721   :  { %v742_v9 = vpop.f32.mrb[8].mxu0 }
 0x722   :  { %v747_v10 = vrot.slane %v742_v9, 2  ;;  %v1127_v11 = vpop.f32.mrb[9].mxu0 }
 0x724   :  { %v749_v12 = vadd.f32 %v747_v10, %v1446_v19 }
 0x726   :  { %1274 = vtanh.f32 %v749_v12 }
 0x730   :  { %v1275_v13 = vpop.eup %1274 }
 0x731   :  { %v767_v14 = vrot.slane %v1275_v13, 6  ;;  %845 = vst.msk [vmem:[#allocation4 - $0x6] sm:$0xc0] %vm844_vm3, %v1275_v13 }
 0x733   :  { %1145 = vmatmul.mubr.msk.f32.vlgmr.msra.gmra.mrb[8].mxu1 %vm127_vm2, %v767_v14 }
 0x734   :  { %1287 = shalt.err (!%p1284_p4)
}
 0x735   :  { %s1288_s17 = scalar_lea.hbm %s1572_s7, 32 }
 0x736   :  { %p1289_p5 = scmp.ne.s32.totalorder %s1572_s7, %s1288_s17  ;;  %p1292_p6 = scmp.lt.u32.totalorder %s1288_s17, %s1572_s7 }
 0x738   :  { %p1294_p7 = pnand %p1292_p6, %p1289_p5 }
 0x73a   :  { %1297 = shalt.err (!%p1294_p7)
}
 0x73b   :  { %865 = dma.vmem_to_hbm [thread:$0]  %s863_s1, 32, %s1572_s7, [#allocation5]   ;;  %v884_v3 = vld [vmem:[%s1570_s5] ss:$0 sm:$0xff]  ;;  %vm842_vm4 = vcmask 9216  }
 0x73c   :  { %s1328_s23 = smov [#allocation2]  }
 0x73d   :  { %s852_s24 = sshll.u32 %s1328_s23, 4  ;;  %s853_s24 = int_to_ptr.vmem [resolvable:$true] %s852_s24 }
 0x73e   :  { %s1298_s25 = scalar_lea.vmem %s853_s24, 32  ;;  %p1303_p9 = scmp.lt.s32.totalorder %s853_s24, %s853_s24 }
 0x73f   :  { %p1299_p8 = scmp.ne.s32.totalorder %s853_s24, %s1298_s25  ;;  %p1304_p10 = scmp.lt.s32.totalorder %s1298_s25, %s1298_s25 }
 0x741   :  { %p1305_p11 = por %p1304_p10, %p1303_p9 }
 0x743   :  { %p1306_p12 = pnand %p1305_p11, %p1299_p8 }
 0x806   :  { %v836_v15 = vpop.f32.mrb[8].mxu1 }
 0x807   :  { %v837_v16 = vadd.f32 %v884_v3, %v836_v15  ;;  %v1146_v17 = vpop.f32.mrb[9].mxu1 }
 0x809   :  { %v886_v18 = vclamps-f32 %v837_v16, 1.0 }
 0x80b   :  { %843 = vst.msk [vmem:[#allocation2] sm:$0x3] %vm842_vm4, %v886_v18 }
 0x80c   :  { %1309 = shalt.err (!%p1306_p12)
}
 0x80d   :  { %s1310_s5 = scalar_lea.hbm %s1571_s6, 32 }
 0x80e   :  { %p1311_p13 = scmp.ne.s32.totalorder %s1571_s6, %s1310_s5  ;;  %p1314_p0 = scmp.lt.u32.totalorder %s1310_s5, %s1571_s6 }
 0x810   :  { %p1316_p1 = pnand %p1314_p0, %p1311_p13 }
 0x812   :  { %1319 = shalt.err (!%p1316_p1)
}
 0x813   :  { %855 = dma.vmem_to_hbm [thread:$0]  %s853_s24, 32, %s1571_s6, [#allocation3]  }
 0x814   :  { %1320 = dma.done.wait [#allocation3], 32  }
 0x815   :  { %1321 = vsyncadd [#allocation3], 4294967264 }
 0x816   :  { %1322 = dma.done.wait [#allocation5], 32  }
 0x817   :  { %1323 = vsyncadd [#allocation5], 4294967264 }
 0x818   :  { %872 = vsyncpa [#allocation3], 1 }
 0x819   :  { %873 = vsyncpa [#allocation5], 1 }

</bundles_post_ra>
